<compile_context>
chip_gen: v5e
topology: v5e:2x2
jax: 0.10.0
libtpu: 0.0.40
codegen_flags: <defaults>
</compile_context>

<pallas_src>
import functools

import jax
import jax.numpy as jnp
from jax import lax
from jax.experimental import pallas as pl
from jax.experimental.pallas import tpu as pltpu

BN_EPS = 1e-5


# --------------------------------------------------------------------------- kernel
def tabular_kernel(x_ref, w0_ref, b0_ref, w1_ref, b1_ref, w2_ref, b2_ref, o_ref):
    """One batch tile: 3 x (matmul + bias), ReLU after the first two.

    Weights carry the MXU dtype (f32 or bf16); accumulation, bias add and ReLU are
    always f32.  BatchNorm is already folded into (w1, b1) / (w2, b2).
    """
    x = x_ref[...].astype(w0_ref.dtype)
    h = jnp.dot(x, w0_ref[...], preferred_element_type=jnp.float32) + b0_ref[...]
    h = jnp.maximum(h, 0.0)

    h = jnp.dot(h.astype(w1_ref.dtype), w1_ref[...],
                preferred_element_type=jnp.float32) + b1_ref[...]
    h = jnp.maximum(h, 0.0)

    h = jnp.dot(h.astype(w2_ref.dtype), w2_ref[...],
                preferred_element_type=jnp.float32) + b2_ref[...]
    o_ref[...] = h.astype(o_ref.dtype)


# --------------------------------------------------------------------------- helpers
def _round_up(n, m):
    return ((n + m - 1) // m) * m


def _pad2(a, rows, cols):
    return jnp.pad(a, ((0, rows - a.shape[0]), (0, cols - a.shape[1])))


def _fold_bn_into_linear(w, b, g, be, m, v, eps=BN_EPS):
    """BN(h) @ w + b  ==  h @ (diag(s) @ w) + (b + (be - m*s) @ w), s = g*rsqrt(v+eps)."""
    s = g * lax.rsqrt(v + eps)                 # [1, F_in]
    w_f = w * s.reshape(-1, 1)                 # scale rows of [F_in, F_out] weight
    b_f = b + (be - m * s) @ w                 # [1, F_out]
    return w_f, b_f


# --------------------------------------------------------------------------- wrapper
@functools.partial(jax.jit, static_argnames=("tb", "mxu_dtype"))
def tabular_net_forward(x, params, *, tb=512, mxu_dtype=jnp.float32):
    """Fused eval-mode MLP forward.  x: [B, input_size] float32 -> [B, output_size]."""
    B, in_size = x.shape
    h0 = params["w0"].shape[1]
    h1 = params["w1"].shape[1]
    out_size = params["w2"].shape[1]

    # Fold the two eval-mode BatchNorms into the Linear layers that follow them.
    w1f, b1f = _fold_bn_into_linear(params["w1"], params["b1"], params["g1"],
                                    params["be1"], params["m1"], params["v1"])
    w2f, b2f = _fold_bn_into_linear(params["w2"], params["b2"], params["g2"],
                                    params["be2"], params["m2"], params["v2"])

    # Lane-dense padding: every feature dim up to a multiple of 128.
    IN_P = _round_up(in_size, 128)
    H0_P = _round_up(h0, 128)
    H1_P = _round_up(h1, 128)
    OUT_P = _round_up(out_size, 128)

    w0p = _pad2(params["w0"], IN_P, H0_P).astype(mxu_dtype)
    b0p = _pad2(params["b0"], 1, H0_P).astype(jnp.float32)
    w1p = _pad2(w1f, H0_P, H1_P).astype(mxu_dtype)
    b1p = _pad2(b1f, 1, H1_P).astype(jnp.float32)
    w2p = _pad2(w2f, H1_P, OUT_P).astype(mxu_dtype)
    b2p = _pad2(b2f, 1, OUT_P).astype(jnp.float32)

    # Batch tiling: TB rows per grid step (capped for small batches), batch padded up.
    TB = min(tb, _round_up(B, 8))
    B_P = _round_up(B, TB)
    xp = _pad2(x, B_P, IN_P).astype(jnp.float32)
    grid = (B_P // TB,)

    def resident(shape):  # weights / biases: DMA'd once, stay VMEM-resident across grid
        return pl.BlockSpec(shape, lambda i: (0, 0))

    flops = 2 * B * (in_size * h0 + h0 * h1 + h1 * out_size)
    bytes_accessed = 4 * (B * in_size + B * out_size) + \
        jnp.dtype(mxu_dtype).itemsize * (in_size * h0 + h0 * h1 + h1 * out_size)

    out_pad = pl.pallas_call(
        tabular_kernel,
        out_shape=jax.ShapeDtypeStruct((B_P, OUT_P), jnp.float32),
        grid=grid,
        in_specs=[
            pl.BlockSpec((TB, IN_P), lambda i: (i, 0)),   # streamed batch tile
            resident((IN_P, H0_P)), resident((1, H0_P)),
            resident((H0_P, H1_P)), resident((1, H1_P)),
            resident((H1_P, OUT_P)), resident((1, OUT_P)),
        ],
        out_specs=pl.BlockSpec((TB, OUT_P), lambda i: (i, 0)),
        compiler_params=pltpu.CompilerParams(
            dimension_semantics=("parallel",)),           # megacore split on v7x
        cost_estimate=pl.CostEstimate(
            flops=int(flops), transcendentals=0,
            bytes_accessed=int(bytes_accessed)),
    )(xp, w0p, b0p, w1p, b1p, w2p, b2p)

    return out_pad[:B, :out_size]


# --------------------------------------------------------------------------- params / reference
def init_params(key, input_size, layers, output_size):
    """Deterministic synthetic parameters mirroring the PyTorch module shapes."""
    h0, h1 = layers
    ks = jax.random.split(key, 8)

    def lin(k, n_in, n_out):
        kw, kb = jax.random.split(k)
        w = jax.random.normal(kw, (n_in, n_out), jnp.float32) * 0.1  # stored transposed
        b = jax.random.normal(kb, (1, n_out), jnp.float32) * 0.1
        return w, b

    def bn(k, n):
        kg, kb, km, kv = jax.random.split(k, 4)
        g = 1.0 + 0.1 * jax.random.normal(kg, (1, n), jnp.float32)
        be = 0.1 * jax.random.normal(kb, (1, n), jnp.float32)
        m = 0.1 * jax.random.normal(km, (1, n), jnp.float32)
        v = 1.0 + 0.1 * jax.random.uniform(kv, (1, n), jnp.float32)
        return g, be, m, v

    w0, b0 = lin(ks[0], input_size, h0)
    g1, be1, m1, v1 = bn(ks[1], h0)
    w1, b1 = lin(ks[2], h0, h1)
    g2, be2, m2, v2 = bn(ks[3], h1)
    w2, b2 = lin(ks[4], h1, output_size)

    return dict(w0=w0, b0=b0,
                g1=g1, be1=be1, m1=m1, v1=v1, w1=w1, b1=b1,
                g2=g2, be2=be2, m2=m2, v2=v2, w2=w2, b2=b2)


def tabular_net_ref(x, p):
    """Pure-JAX reference of the same eval-mode forward pass (no folding / padding)."""
    h = jnp.maximum(x @ p["w0"] + p["b0"], 0.0)
    h = (h - p["m1"]) * lax.rsqrt(p["v1"] + BN_EPS) * p["g1"] + p["be1"]
    h = jnp.maximum(h @ p["w1"] + p["b1"], 0.0)
    h = (h - p["m2"]) * lax.rsqrt(p["v2"] + BN_EPS) * p["g2"] + p["be2"]
    return h @ p["w2"] + p["b2"]


# --------------------------------------------------------------------------- demo
if __name__ == "__main__":
    # TabularNet(input_size=16, output_size=8, layers=[32, 32],
    #            drop_out_probability=[0.1, 0.1], use_batch_norm=True), eval mode.
    input_size, output_size = 16, 8
    hidden = [32, 32]
    batch = 8

    key = jax.random.PRNGKey(0)
    kx, kp = jax.random.split(key)
    x = jax.random.normal(kx, (batch, input_size), jnp.float32)
    params = init_params(kp, input_size, hidden, output_size)

    ref = tabular_net_ref(x, params)

    # f32 MXU path (exact eval-mode semantics).
    out = jax.block_until_ready(tabular_net_forward(x, params, mxu_dtype=jnp.float32))
    assert out.shape == (batch, output_size)
    assert jnp.allclose(out, ref, atol=1e-3, rtol=1e-3), "f32 mismatch vs JAX reference"

    # bf16-weight MXU path (v6e/v7x optimization; f32 accumulation + f32 elementwise).
    out_bf16 = jax.block_until_ready(
        tabular_net_forward(x, params, mxu_dtype=jnp.bfloat16))
    assert jnp.allclose(out_bf16, ref, atol=5e-2, rtol=5e-2), "bf16 mismatch vs reference"

    print("KERNEL_OK")
</pallas_src>

<mosaic_0001>
module attributes {stable_mosaic.version = 11 : i64} {
  func.func @tabular_kernel(%arg0: i32, %arg1: memref<8x128xf32, #tpu.memory_space<vmem>>, %arg2: memref<128x128xf32, #tpu.memory_space<vmem>>, %arg3: memref<1x128xf32, #tpu.memory_space<vmem>>, %arg4: memref<128x128xf32, #tpu.memory_space<vmem>>, %arg5: memref<1x128xf32, #tpu.memory_space<vmem>>, %arg6: memref<128x128xf32, #tpu.memory_space<vmem>>, %arg7: memref<1x128xf32, #tpu.memory_space<vmem>>, %arg8: memref<8x128xf32, #tpu.memory_space<vmem>>) attributes {dimension_semantics = [#tpu.dimension_semantics<parallel>], iteration_bounds = array<i64: 1>, scalar_prefetch = 0 : i64, scratch_operands = 0 : i64, tpu.core_type = #tpu.core_type<tc>, window_params = [{transform_indices = @transform_0, window_bounds = array<i64: 8, 128>}, {pipeline_mode = #tpu.pipeline_mode<synchronous>, transform_indices = @transform_1, window_bounds = array<i64: 128, 128>}, {pipeline_mode = #tpu.pipeline_mode<synchronous>, transform_indices = @transform_2, window_bounds = array<i64: 1, 128>}, {pipeline_mode = #tpu.pipeline_mode<synchronous>, transform_indices = @transform_3, window_bounds = array<i64: 128, 128>}, {pipeline_mode = #tpu.pipeline_mode<synchronous>, transform_indices = @transform_4, window_bounds = array<i64: 1, 128>}, {pipeline_mode = #tpu.pipeline_mode<synchronous>, transform_indices = @transform_5, window_bounds = array<i64: 128, 128>}, {pipeline_mode = #tpu.pipeline_mode<synchronous>, transform_indices = @transform_6, window_bounds = array<i64: 1, 128>}, {transform_indices = @transform_7, window_bounds = array<i64: 8, 128>}]} {
    %c0 = arith.constant 0 : index
    %c0_0 = arith.constant 0 : index
    %0 = vector.load %arg1[%c0, %c0_0] : memref<8x128xf32, #tpu.memory_space<vmem>>, vector<8x128xf32>
    %c0_1 = arith.constant 0 : index
    %c0_2 = arith.constant 0 : index
    %1 = vector.load %arg2[%c0_1, %c0_2] : memref<128x128xf32, #tpu.memory_space<vmem>>, vector<128x128xf32>
    %cst = arith.constant dense<0.000000e+00> : vector<8x128xf32>
    %2 = tpu.matmul %0, %1, %cst {dimension_numbers = #tpu.dot_dimension_numbers<[1], [0], [0], [1], [0, 0, 1, 1], [], []>} : vector<8x128xf32>, vector<128x128xf32>, vector<8x128xf32> -> vector<8x128xf32>
    %c0_3 = arith.constant 0 : index
    %c0_4 = arith.constant 0 : index
    %3 = vector.load %arg3[%c0_3, %c0_4] : memref<1x128xf32, #tpu.memory_space<vmem>>, vector<1x128xf32>
    %4 = vector.broadcast %3 : vector<1x128xf32> to vector<8x128xf32>
    %5 = arith.addf %2, %4 : vector<8x128xf32>
    %cst_5 = arith.constant 0.000000e+00 : f32
    %6 = vector.broadcast %cst_5 : f32 to vector<8x128xf32>
    %7 = arith.maximumf %5, %6 : vector<8x128xf32>
    %c0_6 = arith.constant 0 : index
    %c0_7 = arith.constant 0 : index
    %8 = vector.load %arg4[%c0_6, %c0_7] : memref<128x128xf32, #tpu.memory_space<vmem>>, vector<128x128xf32>
    %cst_8 = arith.constant dense<0.000000e+00> : vector<8x128xf32>
    %9 = tpu.matmul %7, %8, %cst_8 {dimension_numbers = #tpu.dot_dimension_numbers<[1], [0], [0], [1], [0, 0, 1, 1], [], []>} : vector<8x128xf32>, vector<128x128xf32>, vector<8x128xf32> -> vector<8x128xf32>
    %c0_9 = arith.constant 0 : index
    %c0_10 = arith.constant 0 : index
    %10 = vector.load %arg5[%c0_9, %c0_10] : memref<1x128xf32, #tpu.memory_space<vmem>>, vector<1x128xf32>
    %11 = vector.broadcast %10 : vector<1x128xf32> to vector<8x128xf32>
    %12 = arith.addf %9, %11 : vector<8x128xf32>
    %cst_11 = arith.constant 0.000000e+00 : f32
    %13 = vector.broadcast %cst_11 : f32 to vector<8x128xf32>
    %14 = arith.maximumf %12, %13 : vector<8x128xf32>
    %c0_12 = arith.constant 0 : index
    %c0_13 = arith.constant 0 : index
    %15 = vector.load %arg6[%c0_12, %c0_13] : memref<128x128xf32, #tpu.memory_space<vmem>>, vector<128x128xf32>
    %cst_14 = arith.constant dense<0.000000e+00> : vector<8x128xf32>
    %16 = tpu.matmul %14, %15, %cst_14 {dimension_numbers = #tpu.dot_dimension_numbers<[1], [0], [0], [1], [0, 0, 1, 1], [], []>} : vector<8x128xf32>, vector<128x128xf32>, vector<8x128xf32> -> vector<8x128xf32>
    %c0_15 = arith.constant 0 : index
    %c0_16 = arith.constant 0 : index
    %17 = vector.load %arg7[%c0_15, %c0_16] : memref<1x128xf32, #tpu.memory_space<vmem>>, vector<1x128xf32>
    %18 = vector.broadcast %17 : vector<1x128xf32> to vector<8x128xf32>
    %19 = arith.addf %16, %18 : vector<8x128xf32>
    %c0_17 = arith.constant 0 : index
    %c0_18 = arith.constant 0 : index
    %20 = vector.load %arg8[%c0_17, %c0_18] : memref<8x128xf32, #tpu.memory_space<vmem>>, vector<8x128xf32>
    tpu.vector_store %arg8[%c0_17, %c0_18], %19 {strides = array<i32>} : memref<8x128xf32, #tpu.memory_space<vmem>>, vector<8x128xf32>,
    return
  }
  func.func @transform_0(%arg0: i32) -> (i32, i32) {
    %c0_i32 = arith.constant 0 : i32
    %c0_i32_0 = arith.constant 0 : i32
    return %arg0, %c0_i32 : i32, i32
  }
  func.func @transform_1(%arg0: i32) -> (i32, i32) {
    %c0_i32 = arith.constant 0 : i32
    %c0_i32_0 = arith.constant 0 : i32
    %c0_i32_1 = arith.constant 0 : i32
    return %c0_i32, %c0_i32_0 : i32, i32
  }
  func.func @transform_2(%arg0: i32) -> (i32, i32) {
    %c0_i32 = arith.constant 0 : i32
    %c0_i32_0 = arith.constant 0 : i32
    %c0_i32_1 = arith.constant 0 : i32
    return %c0_i32, %c0_i32_0 : i32, i32
  }
  func.func @transform_3(%arg0: i32) -> (i32, i32) {
    %c0_i32 = arith.constant 0 : i32
    %c0_i32_0 = arith.constant 0 : i32
    %c0_i32_1 = arith.constant 0 : i32
    return %c0_i32, %c0_i32_0 : i32, i32
  }
  func.func @transform_4(%arg0: i32) -> (i32, i32) {
    %c0_i32 = arith.constant 0 : i32
    %c0_i32_0 = arith.constant 0 : i32
    %c0_i32_1 = arith.constant 0 : i32
    return %c0_i32, %c0_i32_0 : i32, i32
  }
  func.func @transform_5(%arg0: i32) -> (i32, i32) {
    %c0_i32 = arith.constant 0 : i32
    %c0_i32_0 = arith.constant 0 : i32
    %c0_i32_1 = arith.constant 0 : i32
    return %c0_i32, %c0_i32_0 : i32, i32
  }
  func.func @transform_6(%arg0: i32) -> (i32, i32) {
    %c0_i32 = arith.constant 0 : i32
    %c0_i32_0 = arith.constant 0 : i32
    %c0_i32_1 = arith.constant 0 : i32
    return %c0_i32, %c0_i32_0 : i32, i32
  }
  func.func @transform_7(%arg0: i32) -> (i32, i32) {
    %c0_i32 = arith.constant 0 : i32
    %c0_i32_0 = arith.constant 0 : i32
    return %arg0, %c0_i32 : i32, i32
  }
}

</mosaic_0001>

<bundles_post_ra>
// kernel: tabular_net_forward.1
= control target key start
LH: loop header
LB: loop body
LE: loop exit
PB: predicated region body
PF: predicated region fallthrough
CT: control target
= control target key end

     0   :  { %s397_s0 = inlined_call_operand.vmem [shape: f32[8,128], index: 0, kind: input, shape index: {}]   ;;  %s398_s1 = inlined_call_operand.vmem [shape: f32[128,128], index: 1, kind: input, shape index: {}]   ;;  %s399_s2 = inlined_call_operand.vmem [shape: f32[1,128], index: 2, kind: input, shape index: {}]   ;;  %s400_s3 = inlined_call_operand.vmem [shape: f32[128,128], index: 3, kind: input, shape index: {}]   ;;  %s401_s4 = inlined_call_operand.vmem [shape: f32[1,128], index: 4, kind: input, shape index: {}]   ;;  %s402_s5 = inlined_call_operand.vmem [shape: f32[128,128], index: 5, kind: input, shape index: {}]   ;;  %s403_s6 = inlined_call_operand.vmem [shape: f32[1,128], index: 6, kind: input, shape index: {}]   ;;  %s404_s7 = inlined_call_operand.hbm [shape: f32[8,128], index: 7, kind: output, shape index: {}]  }
   0x1   :  { %v43_v0 = vld [vmem:[%s398_s1 + $0x78] sm:$0xff]  ;;  %v42_v1 = vld [vmem:[%s398_s1 + $0x70] sm:$0xff]  ;;  %v41_v2 = vld [vmem:[%s398_s1 + $0x68] sm:$0xff] }
   0x2   :  { %48 = vmatpush.msra.mxu0 %v43_v0  ;;  %v40_v3 = vld [vmem:[%s398_s1 + $0x60] sm:$0xff]  ;;  %v84_v4 = vld [vmem:[%s400_s3 + $0x78] sm:$0xff]  ;;  %v83_v6 = vld [vmem:[%s400_s3 + $0x70] sm:$0xff] }
   0x3   :  { %v39_v5 = vld [vmem:[%s398_s1 + $0x58] sm:$0xff]  ;;  %89 = vmatpush.msra.mxu1 %v84_v4  ;;  %v82_v7 = vld [vmem:[%s400_s3 + $0x68] sm:$0xff]  ;;  %v38_v8 = vld [vmem:[%s398_s1 + $0x50] sm:$0xff] }
   0x4   :  { %49 = vmatpush.msra.mxu0 %v42_v1  ;;  %v81_v9 = vld [vmem:[%s400_s3 + $0x60] sm:$0xff]  ;;  %v37_v10 = vld [vmem:[%s398_s1 + $0x48] sm:$0xff]  ;;  %v80_v11 = vld [vmem:[%s400_s3 + $0x58] sm:$0xff] }
   0x5   :  { %90 = vmatpush.msra.mxu1 %v83_v6 }
   0x6   :  { %50 = vmatpush.msra.mxu0 %v41_v2 }
   0x7   :  { %91 = vmatpush.msra.mxu1 %v82_v7 }
   0x8   :  { %51 = vmatpush.msra.mxu0 %v40_v3 }
   0xa   :  { %52 = vmatpush.msra.mxu0 %v39_v5 }
   0xc   :  { %53 = vmatpush.msra.mxu0 %v38_v8 }
   0xd   :  { %12 = vsyncpa [#allocation3], 0  ;;  %v36_v12 = vld [vmem:[%s398_s1 + $0x40] sm:$0xff]  ;;  %92 = vmatpush.msra.mxu1 %v81_v9  ;;  %v79_v13 = vld [vmem:[%s400_s3 + $0x50] sm:$0xff]  ;;  %s197_s29 = smov [#allocation2]   ;;  %s158_s10 = sshll.u32 %s404_s7, 4  ;;  %s159_s10 = int_to_ptr.hbm [resolvable:$true] %s158_s10 }
   0xe   :  { %54 = vmatpush.msra.mxu0 %v37_v10  ;;  %v35_v14 = vld [vmem:[%s398_s1 + $0x38] sm:$0xff]  ;;  %v78_v15 = vld [vmem:[%s400_s3 + $0x48] sm:$0xff]  ;;  %v34_v16 = vld [vmem:[%s398_s1 + $0x30] sm:$0xff]  ;;  %s156_s30 = sshll.u32 %s197_s29, 4  ;;  %s157_s30 = int_to_ptr.vmem [resolvable:$true] %s156_s30 }
   0xf   :  { %93 = vmatpush.msra.mxu1 %v80_v11  ;;  %v77_v17 = vld [vmem:[%s400_s3 + $0x40] sm:$0xff]  ;;  %v33_v18 = vld [vmem:[%s398_s1 + $0x28] sm:$0xff]  ;;  %v76_v19 = vld [vmem:[%s400_s3 + $0x38] sm:$0xff] }
  0x10   :  { %55 = vmatpush.msra.mxu0 %v36_v12  ;;  %v32_v20 = vld [vmem:[%s398_s1 + $0x20] sm:$0xff]  ;;  %v75_v21 = vld [vmem:[%s400_s3 + $0x30] sm:$0xff]  ;;  %v31_v22 = vld [vmem:[%s398_s1 + $0x18] sm:$0xff] }
  0x11   :  { %94 = vmatpush.msra.mxu1 %v79_v13  ;;  %v74_v23 = vld [vmem:[%s400_s3 + $0x28] sm:$0xff]  ;;  %v30_v24 = vld [vmem:[%s398_s1 + $0x10] sm:$0xff]  ;;  %v73_v25 = vld [vmem:[%s400_s3 + $0x20] sm:$0xff] }
  0x12   :  { %56 = vmatpush.msra.mxu0 %v35_v14  ;;  %v29_v26 = vld [vmem:[%s398_s1 + $0x8] sm:$0xff]  ;;  %v72_v27 = vld [vmem:[%s400_s3 + $0x18] sm:$0xff]  ;;  %v28_v28 = vld [vmem:[%s398_s1] sm:$0xff] }
  0x13   :  { %95 = vmatpush.msra.mxu1 %v78_v15  ;;  %v27_v29 = vld [vmem:[%s397_s0] sm:$0xff]  ;;  %v71_v30 = vld [vmem:[%s400_s3 + $0x10] sm:$0xff]  ;;  %v70_v31 = vld [vmem:[%s400_s3 + $0x8] sm:$0xff] }
  0x14   :  { %57 = vmatpush.msra.mxu0 %v34_v16  ;;  %v69_v32 = vld [vmem:[%s400_s3] sm:$0xff]  ;;  %v125_v33 = vld [vmem:[%s402_s5 + $0x78] sm:$0xff]  ;;  %v124_v34 = vld [vmem:[%s402_s5 + $0x70] sm:$0xff] }
  0x15   :  { %96 = vmatpush.msra.mxu1 %v77_v17  ;;  %130 = vmatpush.msra.mxu2 %v125_v33  ;;  %v123_v35 = vld [vmem:[%s402_s5 + $0x68] sm:$0xff]  ;;  %v122_v36 = vld [vmem:[%s402_s5 + $0x60] sm:$0xff]  ;;  %v121_v37 = vld [vmem:[%s402_s5 + $0x58] sm:$0xff] }
  0x16   :  { %58 = vmatpush.msra.mxu0 %v33_v18  ;;  %v120_v38 = vld [vmem:[%s402_s5 + $0x50] sm:$0xff]  ;;  %v119_v39 = vld [vmem:[%s402_s5 + $0x48] sm:$0xff]  ;;  %v118_v40 = vld [vmem:[%s402_s5 + $0x40] sm:$0xff] }
  0x17   :  { %97 = vmatpush.msra.mxu1 %v76_v19  ;;  %131 = vmatpush.msra.mxu2 %v124_v34  ;;  %v117_v41 = vld [vmem:[%s402_s5 + $0x38] sm:$0xff]  ;;  %v116_v42 = vld [vmem:[%s402_s5 + $0x30] sm:$0xff]  ;;  %v115_v43 = vld [vmem:[%s402_s5 + $0x28] sm:$0xff] }
  0x18   :  { %59 = vmatpush.msra.mxu0 %v32_v20  ;;  %v114_v44 = vld [vmem:[%s402_s5 + $0x20] sm:$0xff]  ;;  %v113_v45 = vld [vmem:[%s402_s5 + $0x18] sm:$0xff]  ;;  %v112_v50 = vld [vmem:[%s402_s5 + $0x10] sm:$0xff] }
  0x19   :  { %98 = vmatpush.msra.mxu1 %v75_v21  ;;  %132 = vmatpush.msra.mxu2 %v123_v35  ;;  %v168_v46 = vld [vmem:[%s399_s2] ss:$0 sm:$0xff]  ;;  %v111_v51 = vld [vmem:[%s402_s5 + $0x8] sm:$0xff] }
  0x1a   :  { %60 = vmatpush.msra.mxu0 %v31_v22  ;;  %v110_v52 = vld [vmem:[%s402_s5] sm:$0xff] }
  0x1b   :  { %99 = vmatpush.msra.mxu1 %v74_v23  ;;  %133 = vmatpush.msra.mxu2 %v122_v36  ;;  %v169_v53 = vld [vmem:[%s401_s4] ss:$0 sm:$0xff] }
  0x1c   :  { %61 = vmatpush.msra.mxu0 %v30_v24  ;;  %v170_v57 = vld [vmem:[%s403_s6] ss:$0 sm:$0xff] }
  0x1d   :  { %100 = vmatpush.msra.mxu1 %v73_v25  ;;  %134 = vmatpush.msra.mxu2 %v121_v37 }
  0x1e   :  { %62 = vmatpush.msra.mxu0 %v29_v26 }
  0x1f   :  { %101 = vmatpush.msra.mxu1 %v72_v27  ;;  %135 = vmatpush.msra.mxu2 %v120_v38 }
  0x20   :  { %63 = vmatpush.msra.mxu0 %v28_v28 }
  0x21   :  { %64 = vmatmul.f32.vlgmr.msra.gmra.mxu0 %v27_v29  ;;  %102 = vmatpush.msra.mxu1 %v71_v30 }
  0x22   :  { %136 = vmatpush.msra.mxu2 %v119_v39 }
  0x23   :  { %103 = vmatpush.msra.mxu1 %v70_v31 }
  0x24   :  { %137 = vmatpush.msra.mxu2 %v118_v40 }
  0x25   :  { %104 = vmatpush.msra.mxu1 %v69_v32 }
  0x26   :  { %138 = vmatpush.msra.mxu2 %v117_v41 }
  0x28   :  { %139 = vmatpush.msra.mxu2 %v116_v42 }
  0x2a   :  { %140 = vmatpush.msra.mxu2 %v115_v43 }
  0x2c   :  { %141 = vmatpush.msra.mxu2 %v114_v44 }
  0x2e   :  { %142 = vmatpush.msra.mxu2 %v113_v45 }
  0x30   :  { %143 = vmatpush.msra.mxu2 %v112_v50 }
  0x32   :  { %144 = vmatpush.msra.mxu2 %v111_v51 }
  0x34   :  { %145 = vmatpush.msra.mxu2 %v110_v52 }
  0x9e   :  { %v65_v47 = vpop.f32.mrf.mxu0 }
  0x9f   :  { %v66_v48 = vadd.f32 %v168_v46, %v65_v47 }
  0xa1   :  { %v68_v49 = vmax.f32 %v66_v48, 0.0 }
  0xa3   :  { %105 = vmatmul.f32.vlgmr.msra.gmra.mxu1 %v68_v49 }
 0x120   :  { %v106_v54 = vpop.f32.mrf.mxu1 }
 0x121   :  { %v107_v55 = vadd.f32 %v169_v53, %v106_v54 }
 0x123   :  { %v109_v56 = vmax.f32 %v107_v55, 0.0 }
 0x125   :  { %146 = vmatmul.f32.vlgmr.msra.gmra.mxu2 %v109_v56 }
 0x1a8   :  { %v147_v58 = vpop.f32.mrf.mxu2 }
 0x1a9   :  { %v148_v59 = vadd.f32 %v170_v57, %v147_v58 }
 0x1ab   :  { %150 = vst [vmem:[#allocation2] sm:$0xff] %v148_v59 }
 0x1ac   :  { %161 = dma.vmem_to_hbm [thread:$0]  %s157_s30, 128, %s159_s10, [#allocation3]  }
 0x1ad   :  { %195 = dma.done.wait [#allocation3], 128  }
 0x1ae   :  { %196 = vsyncadd [#allocation3], 4294967168 }
 0x1af   :  { %166 = vsyncpa [#allocation3], 1 }

</bundles_post_ra>
